<compile_context>
chip_gen: v6e
topology: v6e:2x2x1
jax: 0.10.0
libtpu: 0.0.40
codegen_flags: <defaults>
</compile_context>

<pallas_src>
import functools

import jax
import jax.numpy as jnp
from jax import lax
from jax.experimental import pallas as pl
from jax.experimental.pallas import tpu as pltpu

LANES = 128
MAX_TILE_ROWS = 8192                    # (8192,128) f32 = 4 MiB per input block
VMEM_LIMIT_BYTES = 32 * 1024 * 1024     # 2 inputs x 2 pipeline bufs x 4 MiB = 16 MiB << 32


# ----------------------------------------------------------------------------
# Kernel 1: per-chunk partial sums of |x - t| over non-NaN x (nanmean numerators)
# ----------------------------------------------------------------------------
def _scale_stats_kernel(n_rows, needs_mask, t_ref, gt_ref, pr_ref, sgt_ref, spr_ref):
    tile_rows = gt_ref.shape[0]
    gt = gt_ref[...].astype(jnp.float32)
    pr = pr_ref[...].astype(jnp.float32)
    t_gt = t_ref[0]
    t_pr = t_ref[1]

    def emit(row_mask):
        v_gt = jnp.logical_not(jnp.isnan(gt))
        v_pr = jnp.logical_not(jnp.isnan(pr))
        if row_mask is not None:
            v_gt = jnp.logical_and(v_gt, row_mask)
            v_pr = jnp.logical_and(v_pr, row_mask)
        a_gt = jnp.where(v_gt, jnp.abs(gt - t_gt), 0.0)
        a_pr = jnp.where(v_pr, jnp.abs(pr - t_pr), 0.0)
        sgt_ref[...] = jnp.sum(a_gt, axis=0, keepdims=True)
        spr_ref[...] = jnp.sum(a_pr, axis=0, keepdims=True)

    if not needs_mask:
        emit(None)                                   # fast path: no mask VPU work
    else:
        rows_left = n_rows - pl.program_id(0) * tile_rows

        @pl.when(rows_left >= tile_rows)
        def _():                                     # all but the last chunk
            emit(None)

        @pl.when(rows_left < tile_rows)
        def _():                                     # last (partial) chunk only
            row_ids = lax.broadcasted_iota(jnp.int32, (tile_rows, LANES), 0)
            emit(row_ids < rows_left)


# ----------------------------------------------------------------------------
# Kernel 2: per-chunk partial sums of the masked affine-invariant error
# ----------------------------------------------------------------------------
def _loss_sum_kernel(n_rows, needs_mask, s_ref, gt_ref, pr_ref, loss_ref):
    tile_rows = gt_ref.shape[0]
    gt = gt_ref[...].astype(jnp.float32)
    pr = pr_ref[...].astype(jnp.float32)
    t_gt = s_ref[0]
    t_pr = s_ref[1]
    inv_s_gt = s_ref[2]
    inv_s_pr = s_ref[3]

    def emit(row_mask):
        # Multiply by precomputed reciprocal: stays on the 4-wide VALU slots
        # (a per-element divide would make the EUP the binding unit).
        ss_gt = (gt - t_gt) * inv_s_gt
        ss_pr = (pr - t_pr) * inv_s_pr
        valid = jnp.isfinite(ss_gt)
        if row_mask is not None:
            valid = jnp.logical_and(valid, row_mask)
        lm = jnp.where(valid, jnp.abs(ss_pr - ss_gt), 0.0)
        loss_ref[...] = jnp.sum(lm, axis=0, keepdims=True)

    if not needs_mask:
        emit(None)
    else:
        rows_left = n_rows - pl.program_id(0) * tile_rows

        @pl.when(rows_left >= tile_rows)
        def _():
            emit(None)

        @pl.when(rows_left < tile_rows)
        def _():
            row_ids = lax.broadcasted_iota(jnp.int32, (tile_rows, LANES), 0)
            emit(row_ids < rows_left)


# ----------------------------------------------------------------------------
# Wrappers
# ----------------------------------------------------------------------------
def _flatten_lanes(x):
    """Flatten to a lane-dense (rows, 128) view.

    When size % 128 == 0 (common case) this is a free reshape.  Otherwise a
    <128-element NaN lane remainder is padded, which does materialize a padded
    copy (rare; see TODO in the header about a pad-free 1-D streaming path).
    """
    flat = x.reshape(-1)
    rem = flat.shape[0] % LANES
    if rem:
        flat = jnp.pad(flat, (0, LANES - rem), constant_values=jnp.nan)
    return flat.reshape(-1, LANES)


def _nanmedian_and_count(x):
    """torch.nanmedian (lower median) of one map + its non-NaN count.

    No stacked copy: the map is sorted from its own flat view; the count is
    reused by the caller as the nanmean denominator of pass 1.
    """
    # TODO(synk): replace with a streaming histogram / radix median-select
    # Pallas kernel; the O(N log N) sort dominates for multi-megapixel maps.
    flat = x.reshape(-1).astype(jnp.float32)
    n_valid = jnp.sum(jnp.logical_not(jnp.isnan(flat)))
    srt = jnp.sort(flat)                              # NaNs sort to the end
    idx = jnp.maximum(n_valid - 1, 0) // 2            # torch lower-median index
    med = srt[idx]
    med = jnp.where(n_valid > 0, med, jnp.nan)        # all-NaN input -> NaN (torch)
    return med, n_valid


@functools.partial(jax.jit, static_argnames=("trim_factor",))
def affine_invariant_loss(disparity_map_gt, disparity_map_pred,
                          trim_factor: float = 0.2):
    assert disparity_map_gt.ndim == 4
    assert disparity_map_gt.shape == disparity_map_pred.shape
    # trim_factor / topk are dead code in the reference forward: the loss is
    # the plain mean over all elements of the zero-filled loss map.
    del trim_factor

    if not jnp.issubdtype(disparity_map_gt.dtype, jnp.floating):
        disparity_map_gt = disparity_map_gt.astype(jnp.float32)
    if not jnp.issubdtype(disparity_map_pred.dtype, jnp.floating):
        disparity_map_pred = disparity_map_pred.astype(jnp.float32)

    n_total = disparity_map_gt.size                   # static python int

    gt2d = _flatten_lanes(disparity_map_gt)
    pr2d = _flatten_lanes(disparity_map_pred)
    n_rows = gt2d.shape[0]
    itemsize = jnp.dtype(gt2d.dtype).itemsize

    # Static tiling decisions.  Either the block covers the full row dim
    # (always a legal tiling) or it is 8192 rows (a multiple of 32, legal for
    # f32 / bf16 / 8-bit sublane packing alike).
    if n_rows <= MAX_TILE_ROWS:
        tile_rows = n_rows
    else:
        tile_rows = MAX_TILE_ROWS
    n_chunks = -(-n_rows // tile_rows)
    needs_mask = (n_rows % tile_rows) != 0

    tile_spec = pl.BlockSpec((tile_rows, LANES), lambda i: (i, 0))
    smem_spec = pl.BlockSpec(memory_space=pltpu.MemorySpace.SMEM)
    part_spec = pl.BlockSpec((1, LANES), lambda i: (i, 0))
    part_shape = jax.ShapeDtypeStruct((n_chunks, LANES), jnp.float32)

    cparams = pltpu.CompilerParams(
        dimension_semantics=("parallel",),
        vmem_limit_bytes=VMEM_LIMIT_BYTES)

    n_elems = n_rows * LANES
    read_bytes = 2 * n_elems * itemsize
    stats_cost = pl.CostEstimate(flops=10 * n_elems, transcendentals=0,
                                 bytes_accessed=read_bytes + 2 * n_chunks * LANES * 4)
    loss_cost = pl.CostEstimate(flops=10 * n_elems, transcendentals=0,
                                bytes_accessed=read_bytes + n_chunks * LANES * 4)

    # ---- nanmedian shifts + non-NaN counts (glue JAX; no stacked copy) ----
    t_gt, cnt_gt = _nanmedian_and_count(disparity_map_gt)
    t_pr, cnt_pr = _nanmedian_and_count(disparity_map_pred)
    shifts = jnp.stack([t_gt, t_pr]).astype(jnp.float32)

    # ---- pass 1: sum(|x - t|) over non-NaN x (Pallas) ----
    sabs_gt, sabs_pr = pl.pallas_call(
        functools.partial(_scale_stats_kernel, n_rows, needs_mask),
        grid=(n_chunks,),
        in_specs=[smem_spec, tile_spec, tile_spec],
        out_specs=(part_spec, part_spec),
        out_shape=(part_shape, part_shape),
        compiler_params=cparams,
        cost_estimate=stats_cost,
    )(shifts, gt2d, pr2d)

    # nanmean = sum / count  (non-NaN counts reused from the median step).
    s_gt = jnp.sum(sabs_gt) / cnt_gt.astype(jnp.float32)
    s_pr = jnp.sum(sabs_pr) / cnt_pr.astype(jnp.float32)

    # ---- pass 2: masked |ss_pred - ss_gt| partial sums (Pallas) ----
    scalars = jnp.stack([t_gt, t_pr, 1.0 / s_gt, 1.0 / s_pr]).astype(jnp.float32)
    loss_part = pl.pallas_call(
        functools.partial(_loss_sum_kernel, n_rows, needs_mask),
        grid=(n_chunks,),
        in_specs=[smem_spec, tile_spec, tile_spec],
        out_specs=part_spec,
        out_shape=part_shape,
        compiler_params=cparams,
        cost_estimate=loss_cost,
    )(scalars, gt2d, pr2d)

    # Mean over ALL elements (matches torch.mean of the zero-filled loss map).
    return jnp.sum(loss_part) / jnp.float32(n_total)


# ----------------------------------------------------------------------------
# Pure-JAX reference (same lower-median convention) for a sanity check
# ----------------------------------------------------------------------------
def _reference(gt, pred):
    gt = gt.astype(jnp.float32)
    pred = pred.astype(jnp.float32)

    def nanmed(x):
        flat = x.reshape(-1)
        nv = jnp.sum(jnp.logical_not(jnp.isnan(flat)))
        s = jnp.sort(flat)
        return s[jnp.maximum(nv - 1, 0) // 2]

    t_gt = nanmed(gt)
    t_pr = nanmed(pred)
    s_gt = jnp.nanmean(jnp.abs(gt - t_gt))
    s_pr = jnp.nanmean(jnp.abs(pred - t_pr))
    ss_gt = (gt - t_gt) / s_gt
    ss_pr = (pred - t_pr) / s_pr
    valid = jnp.isfinite(ss_gt)
    return jnp.mean(jnp.where(valid, jnp.abs(ss_pr - ss_gt), 0.0))


if __name__ == "__main__":
    key = jax.random.PRNGKey(0)
    k1, k2, k3, k4, k5, k6, k7 = jax.random.split(key, 7)

    # Case 1: small lane-aligned shape with NaNs in gt (exercises the NaN path).
    B, C, H, W = 2, 4, 16, 16
    gt = jax.random.normal(k1, (B, C, H, W), dtype=jnp.float32) * 3.0 + 1.5
    pred = gt + 0.25 * jax.random.normal(k2, (B, C, H, W), dtype=jnp.float32)
    nan_mask = jax.random.uniform(k3, (B, C, H, W)) < 0.05
    gt = jnp.where(nan_mask, jnp.nan, gt)

    loss = jax.block_until_ready(affine_invariant_loss(gt, pred, trim_factor=0.2))
    ref = jax.block_until_ready(_reference(gt, pred))
    assert jnp.isfinite(loss), f"non-finite loss: {loss}"
    assert jnp.allclose(loss, ref, rtol=1e-4, atol=1e-6), (loss, ref)

    # Case 2: awkward (non-128-divisible) shape exercising the lane-pad path.
    B2, C2, H2, W2 = 1, 3, 17, 19
    gt2 = jax.random.normal(k4, (B2, C2, H2, W2), dtype=jnp.float32) * 2.0 - 0.5
    pred2 = gt2 + 0.1 * jax.random.normal(k5, (B2, C2, H2, W2), dtype=jnp.float32)
    gt2 = gt2.at[0, 0, 0, 0].set(jnp.nan)

    loss2 = jax.block_until_ready(affine_invariant_loss(gt2, pred2, trim_factor=0.2))
    ref2 = jax.block_until_ready(_reference(gt2, pred2))
    assert jnp.isfinite(loss2), f"non-finite loss: {loss2}"
    assert jnp.allclose(loss2, ref2, rtol=1e-4, atol=1e-6), (loss2, ref2)

    # Case 3: multi-chunk grid with a partial last chunk (exercises the
    # pl.when masked slow path and multi-step pipelining); lane-aligned size.
    B3, C3, H3, W3 = 1, 1, 1200, 1000          # 1.2M elems -> 9375 rows of 128
    gt3 = jax.random.normal(k6, (B3, C3, H3, W3), dtype=jnp.float32) * 4.0 + 2.0
    pred3 = gt3 + 0.2 * jax.random.normal(k7, (B3, C3, H3, W3), dtype=jnp.float32)
    gt3 = jnp.where(jax.random.uniform(k3, (B3, C3, H3, W3)) < 0.02, jnp.nan, gt3)

    loss3 = jax.block_until_ready(affine_invariant_loss(gt3, pred3, trim_factor=0.2))
    ref3 = jax.block_until_ready(_reference(gt3, pred3))
    assert jnp.isfinite(loss3), f"non-finite loss: {loss3}"
    assert jnp.allclose(loss3, ref3, rtol=1e-4, atol=1e-6), (loss3, ref3)

    print("KERNEL_OK")
</pallas_src>

<mosaic_0001>
module attributes {stable_mosaic.version = 11 : i64} {
  func.func @_scale_stats_kernel(%arg0: i32, %arg1: memref<2xf32, #tpu.memory_space<smem>>, %arg2: memref<16x128xf32, #tpu.memory_space<vmem>>, %arg3: memref<16x128xf32, #tpu.memory_space<vmem>>, %arg4: memref<1x128xf32, #tpu.memory_space<vmem>>, %arg5: memref<1x128xf32, #tpu.memory_space<vmem>>) attributes {dimension_semantics = [#tpu.dimension_semantics<parallel>], iteration_bounds = array<i64: 1>, scalar_prefetch = 0 : i64, scratch_operands = 0 : i64, tpu.core_type = #tpu.core_type<tc>, window_params = [{transform_indices = @transform_0, window_bounds = array<i64: 2>}, {transform_indices = @transform_1, window_bounds = array<i64: 16, 128>}, {transform_indices = @transform_2, window_bounds = array<i64: 16, 128>}, {transform_indices = @transform_3, window_bounds = array<i64: 1, 128>}, {transform_indices = @transform_4, window_bounds = array<i64: 1, 128>}]} {
    %c0 = arith.constant 0 : index
    %c0_0 = arith.constant 0 : index
    %0 = vector.load %arg2[%c0, %c0_0] : memref<16x128xf32, #tpu.memory_space<vmem>>, vector<16x128xf32>
    %c0_1 = arith.constant 0 : index
    %c0_2 = arith.constant 0 : index
    %1 = vector.load %arg3[%c0_1, %c0_2] : memref<16x128xf32, #tpu.memory_space<vmem>>, vector<16x128xf32>
    %c0_3 = arith.constant 0 : index
    %2 = memref.load %arg1[%c0_3] : memref<2xf32, #tpu.memory_space<smem>>
    %c1 = arith.constant 1 : index
    %3 = memref.load %arg1[%c1] : memref<2xf32, #tpu.memory_space<smem>>
    %4 = arith.cmpf one, %0, %0 : vector<16x128xf32>
    %cst = arith.constant dense<true> : vector<16x128xi1>
    %5 = arith.xori %4, %cst : vector<16x128xi1>
    %6 = arith.cmpf one, %1, %1 : vector<16x128xf32>
    %cst_4 = arith.constant dense<true> : vector<16x128xi1>
    %7 = arith.xori %6, %cst_4 : vector<16x128xi1>
    %8 = vector.broadcast %2 : f32 to vector<16x128xf32>
    %9 = arith.subf %0, %8 : vector<16x128xf32>
    %10 = math.absf %9 : vector<16x128xf32>
    %cst_5 = arith.constant 0.000000e+00 : f32
    %11 = vector.broadcast %cst_5 : f32 to vector<16x128xf32>
    %12 = arith.select %5, %10, %11 : vector<16x128xi1>, vector<16x128xf32>
    %13 = vector.broadcast %3 : f32 to vector<16x128xf32>
    %14 = arith.subf %1, %13 : vector<16x128xf32>
    %15 = math.absf %14 : vector<16x128xf32>
    %cst_6 = arith.constant 0.000000e+00 : f32
    %16 = vector.broadcast %cst_6 : f32 to vector<16x128xf32>
    %17 = arith.select %7, %15, %16 : vector<16x128xi1>, vector<16x128xf32>
    %cst_7 = arith.constant dense<0.000000e+00> : vector<128xf32>
    %18 = vector.multi_reduction <add>, %12, %cst_7 [0] : vector<16x128xf32> to vector<128xf32>
    %19 = vector.shape_cast %18 : vector<128xf32> to vector<1x128xf32>
    %c0_8 = arith.constant 0 : index
    %c0_9 = arith.constant 0 : index
    %20 = vector.load %arg4[%c0_8, %c0_9] : memref<1x128xf32, #tpu.memory_space<vmem>>, vector<1x128xf32>
    tpu.vector_store %arg4[%c0_8, %c0_9], %19 {strides = array<i32>} : memref<1x128xf32, #tpu.memory_space<vmem>>, vector<1x128xf32>,
    %cst_10 = arith.constant dense<0.000000e+00> : vector<128xf32>
    %21 = vector.multi_reduction <add>, %17, %cst_10 [0] : vector<16x128xf32> to vector<128xf32>
    %22 = vector.shape_cast %21 : vector<128xf32> to vector<1x128xf32>
    %c0_11 = arith.constant 0 : index
    %c0_12 = arith.constant 0 : index
    %23 = vector.load %arg5[%c0_11, %c0_12] : memref<1x128xf32, #tpu.memory_space<vmem>>, vector<1x128xf32>
    tpu.vector_store %arg5[%c0_11, %c0_12], %22 {strides = array<i32>} : memref<1x128xf32, #tpu.memory_space<vmem>>, vector<1x128xf32>,
    return
  }
  func.func @transform_0(%arg0: i32) -> i32 {
    %c0_i32 = arith.constant 0 : i32
    %c0_i32_0 = arith.constant 0 : i32
    return %c0_i32 : i32
  }
  func.func @transform_1(%arg0: i32) -> (i32, i32) {
    %c0_i32 = arith.constant 0 : i32
    %c0_i32_0 = arith.constant 0 : i32
    return %arg0, %c0_i32 : i32, i32
  }
  func.func @transform_2(%arg0: i32) -> (i32, i32) {
    %c0_i32 = arith.constant 0 : i32
    %c0_i32_0 = arith.constant 0 : i32
    return %arg0, %c0_i32 : i32, i32
  }
  func.func @transform_3(%arg0: i32) -> (i32, i32) {
    %c0_i32 = arith.constant 0 : i32
    %c0_i32_0 = arith.constant 0 : i32
    return %arg0, %c0_i32 : i32, i32
  }
  func.func @transform_4(%arg0: i32) -> (i32, i32) {
    %c0_i32 = arith.constant 0 : i32
    %c0_i32_0 = arith.constant 0 : i32
    return %arg0, %c0_i32 : i32, i32
  }
}

module attributes {stable_mosaic.version = 11 : i64} {
  func.func @_loss_sum_kernel(%arg0: i32, %arg1: memref<4xf32, #tpu.memory_space<smem>>, %arg2: memref<16x128xf32, #tpu.memory_space<vmem>>, %arg3: memref<16x128xf32, #tpu.memory_space<vmem>>, %arg4: memref<1x128xf32, #tpu.memory_space<vmem>>) attributes {dimension_semantics = [#tpu.dimension_semantics<parallel>], iteration_bounds = array<i64: 1>, scalar_prefetch = 0 : i64, scratch_operands = 0 : i64, tpu.core_type = #tpu.core_type<tc>, window_params = [{transform_indices = @transform_0, window_bounds = array<i64: 4>}, {transform_indices = @transform_1, window_bounds = array<i64: 16, 128>}, {transform_indices = @transform_2, window_bounds = array<i64: 16, 128>}, {transform_indices = @transform_3, window_bounds = array<i64: 1, 128>}]} {
    %c0 = arith.constant 0 : index
    %c0_0 = arith.constant 0 : index
    %0 = vector.load %arg2[%c0, %c0_0] : memref<16x128xf32, #tpu.memory_space<vmem>>, vector<16x128xf32>
    %c0_1 = arith.constant 0 : index
    %c0_2 = arith.constant 0 : index
    %1 = vector.load %arg3[%c0_1, %c0_2] : memref<16x128xf32, #tpu.memory_space<vmem>>, vector<16x128xf32>
    %c0_3 = arith.constant 0 : index
    %2 = memref.load %arg1[%c0_3] : memref<4xf32, #tpu.memory_space<smem>>
    %c1 = arith.constant 1 : index
    %3 = memref.load %arg1[%c1] : memref<4xf32, #tpu.memory_space<smem>>
    %c2 = arith.constant 2 : index
    %4 = memref.load %arg1[%c2] : memref<4xf32, #tpu.memory_space<smem>>
    %c3 = arith.constant 3 : index
    %5 = memref.load %arg1[%c3] : memref<4xf32, #tpu.memory_space<smem>>
    %6 = vector.broadcast %2 : f32 to vector<16x128xf32>
    %7 = arith.subf %0, %6 : vector<16x128xf32>
    %8 = vector.broadcast %4 : f32 to vector<16x128xf32>
    %9 = arith.mulf %7, %8 : vector<16x128xf32>
    %10 = vector.broadcast %3 : f32 to vector<16x128xf32>
    %11 = arith.subf %1, %10 : vector<16x128xf32>
    %12 = vector.broadcast %5 : f32 to vector<16x128xf32>
    %13 = arith.mulf %11, %12 : vector<16x128xf32>
    %14 = tpu.weird %9 : vector<16x128xf32> -> vector<16x128xi1>
    %cst = arith.constant dense<true> : vector<16x128xi1>
    %15 = arith.xori %14, %cst : vector<16x128xi1>
    %16 = arith.subf %13, %9 : vector<16x128xf32>
    %17 = math.absf %16 : vector<16x128xf32>
    %cst_4 = arith.constant 0.000000e+00 : f32
    %18 = vector.broadcast %cst_4 : f32 to vector<16x128xf32>
    %19 = arith.select %15, %17, %18 : vector<16x128xi1>, vector<16x128xf32>
    %cst_5 = arith.constant dense<0.000000e+00> : vector<128xf32>
    %20 = vector.multi_reduction <add>, %19, %cst_5 [0] : vector<16x128xf32> to vector<128xf32>
    %21 = vector.shape_cast %20 : vector<128xf32> to vector<1x128xf32>
    %c0_6 = arith.constant 0 : index
    %c0_7 = arith.constant 0 : index
    %22 = vector.load %arg4[%c0_6, %c0_7] : memref<1x128xf32, #tpu.memory_space<vmem>>, vector<1x128xf32>
    tpu.vector_store %arg4[%c0_6, %c0_7], %21 {strides = array<i32>} : memref<1x128xf32, #tpu.memory_space<vmem>>, vector<1x128xf32>,
    return
  }
  func.func @transform_0(%arg0: i32) -> i32 {
    %c0_i32 = arith.constant 0 : i32
    %c0_i32_0 = arith.constant 0 : i32
    return %c0_i32 : i32
  }
  func.func @transform_1(%arg0: i32) -> (i32, i32) {
    %c0_i32 = arith.constant 0 : i32
    %c0_i32_0 = arith.constant 0 : i32
    return %arg0, %c0_i32 : i32, i32
  }
  func.func @transform_2(%arg0: i32) -> (i32, i32) {
    %c0_i32 = arith.constant 0 : i32
    %c0_i32_0 = arith.constant 0 : i32
    return %arg0, %c0_i32 : i32, i32
  }
  func.func @transform_3(%arg0: i32) -> (i32, i32) {
    %c0_i32 = arith.constant 0 : i32
    %c0_i32_0 = arith.constant 0 : i32
    return %arg0, %c0_i32 : i32, i32
  }
}

</mosaic_0001>

<bundles_post_ra>
// kernel: affine_invariant_loss.2
= control target key start
LH: loop header
LB: loop body
LE: loop exit
PB: predicated region body
PF: predicated region fallthrough
CT: control target
= control target key end

     0   :  { %10 = vsyncpa [#allocation3], 0  ;;  %s147_s0 = inlined_call_operand.vmem [shape: f32[2], index: 0, kind: input, shape index: {}]   ;;  %s148_s1 = inlined_call_operand.vmem [shape: f32[16,128], index: 1, kind: input, shape index: {}]   ;;  %s149_s2 = inlined_call_operand.vmem [shape: f32[16,128], index: 2, kind: input, shape index: {}]   ;;  %s150_s3 = inlined_call_operand.vmem [shape: f32[1,128], index: 3, kind: output, shape index: {0}]   ;;  %s151_s4 = inlined_call_operand.vmem [shape: f32[1,128], index: 4, kind: output, shape index: {1}]  }
   0x1   :  { %s17_s17 = sshll.u32 %s147_s0, 4  ;;  %s18_s17 = int_to_ptr.vmem [resolvable:$true] %s17_s17 }
   0x2   :  { %s85_s18 = scalar_lea.vmem %s18_s17, 16  ;;  %p90_p1 = scmp.lt.s32.totalorder %s18_s17, %s18_s17 }
   0x3   :  { %p86_p0 = scmp.ne.s32.totalorder %s18_s17, %s85_s18  ;;  %p91_p2 = scmp.lt.s32.totalorder %s85_s18, %s85_s18 }
   0x5   :  { %p92_p3 = por %p91_p2, %p90_p1 }
   0x7   :  { %p93_p4 = pnand %p92_p3, %p86_p0 }
   0x9   :  { %96 = shalt.err (!%p93_p4)
}
   0xa   :  { %s99_s19 = smov [#allocation2]  }
   0xb   :  { %20 = dma.vmem_to_smem %s18_s17, 16, %s99_s19, [#allocation3]  }
   0xc   :  { %97 = dma.done.wait [#allocation3], 16  }
   0xd   :  { %98 = vsyncadd [#allocation3], 4294967280 }
   0xe   :  { %28 = sfence }
   0xf   :  { %s33_s20 = sld [smem:[#allocation2]]  ;;  %v29_v0 = vld [vmem:[%s148_s1] sm:$0xff]  ;;  %v30_v1 = vld [vmem:[%s148_s1 + $0x8] sm:$0xff]  ;;  %vm100_vm3 = vmmov 1  }
  0x10   :  { %s82_s21 = sld [smem:[#allocation2 + $0x1]]  ;;  %vm35_vm0 = vcmp.ne.f32.partialorder %v29_v0, %v29_v0  ;;  %vm36_vm1 = vcmp.ne.f32.partialorder %v30_v1, %v30_v1  ;;  %v31_v2 = vld [vmem:[%s149_s2] sm:$0xff]  ;;  %v32_v3 = vld [vmem:[%s149_s2 + $0x8] sm:$0xff] }
  0x11   :  { %vm39_vm2 = vcmp.ne.f32.partialorder %v31_v2, %v31_v2  ;;  %vm37_vm4 = vmxor %vm35_vm0, %vm100_vm3  ;;  %vm40_vm5 = vcmp.ne.f32.partialorder %v32_v3, %v32_v3 }
  0x12   :  { %vm38_vm6 = vmxor %vm36_vm1, %vm100_vm3 }
  0x13   :  { %vm41_vm7 = vmxor %vm39_vm2, %vm100_vm3 }
  0x14   :  { %vm42_vm8 = vmxor %vm40_vm5, %vm100_vm3 }
  0x15   :  { %v43_v4 = vstv %s33_s20 }
  0x16   :  { %v44_v5 = vsub.f32 %v29_v0, %v43_v4  ;;  %v45_v6 = vsub.f32 %v30_v1, %v43_v4  ;;  %v50_v7 = vstv %s82_s21 }
  0x17   :  { %v51_v8 = vsub.f32 %v31_v2, %v50_v7  ;;  %v52_v9 = vsub.f32 %v32_v3, %v50_v7 }
  0x18   :  { %v46_v10 = vand.u32 2147483647, %v44_v5  ;;  %v47_v11 = vand.u32 2147483647, %v45_v6 }
  0x19   :  { %v53_v12 = vand.u32 2147483647, %v51_v8  ;;  %v54_v13 = vand.u32 2147483647, %v52_v9 }
  0x1a   :  { %v48_v14 = vsel %vm37_vm4, %v46_v10, 0.0  ;;  %v49_v15 = vsel %vm38_vm6, %v47_v11, 0.0 }
  0x1b   :  { %v57_v16 = vadd.f32 %v49_v15, %v48_v14  ;;  %v55_v17 = vsel %vm41_vm7, %v53_v12, 0.0  ;;  %v56_v18 = vsel %vm42_vm8, %v54_v13, 0.0 }
  0x1c   :  { %v65_v19 = vadd.f32 %v56_v18, %v55_v17 }
  0x1d   :  { %v58_v20 = vrot.slane %v57_v16, 4 }
  0x1e   :  { %v66_v21 = vrot.slane %v65_v19, 4 }
  0x1f   :  { %v59_v22 = vadd.f32 %v58_v20, %v57_v16 }
  0x20   :  { %v67_v23 = vadd.f32 %v66_v21, %v65_v19 }
  0x21   :  { %v60_v24 = vrot.slane %v59_v22, 2 }
  0x22   :  { %v68_v25 = vrot.slane %v67_v23, 2 }
  0x23   :  { %v61_v26 = vadd.f32 %v60_v24, %v59_v22 }
  0x24   :  { %v69_v27 = vadd.f32 %v68_v25, %v67_v23 }
  0x25   :  { %v62_v28 = vrot.slane %v61_v26, 1 }
  0x26   :  { %v70_v29 = vrot.slane %v69_v27, 1 }
  0x27   :  { %v63_v30 = vadd.f32 %v62_v28, %v61_v26 }
  0x28   :  { %v71_v31 = vadd.f32 %v70_v29, %v69_v27 }
  0x29   :  { %64 = vst [vmem:[%s150_s3] sm:$0x1] %v63_v30 }
  0x2a   :  { %72 = vst [vmem:[%s151_s4] sm:$0x1] %v71_v31 }
  0x2b   :  { %81 = vsyncpa [#allocation3], 1 }

// kernel: affine_invariant_loss.3
= control target key start
LH: loop header
LB: loop body
LE: loop exit
PB: predicated region body
PF: predicated region fallthrough
CT: control target
= control target key end

     0   :  { %8 = vsyncpa [#allocation3], 0  ;;  %s129_s0 = inlined_call_operand.vmem [shape: f32[4], index: 0, kind: input, shape index: {}]   ;;  %s130_s1 = inlined_call_operand.vmem [shape: f32[16,128], index: 1, kind: input, shape index: {}]   ;;  %s131_s2 = inlined_call_operand.vmem [shape: f32[16,128], index: 2, kind: input, shape index: {}]   ;;  %s132_s3 = inlined_call_operand.vmem [shape: f32[1,128], index: 3, kind: output, shape index: {}]  }
   0x1   :  { %s15_s14 = sshll.u32 %s129_s0, 4  ;;  %s16_s14 = int_to_ptr.vmem [resolvable:$true] %s15_s14 }
   0x2   :  { %s75_s15 = scalar_lea.vmem %s16_s14, 16  ;;  %p80_p1 = scmp.lt.s32.totalorder %s16_s14, %s16_s14 }
   0x3   :  { %p76_p0 = scmp.ne.s32.totalorder %s16_s14, %s75_s15  ;;  %p81_p2 = scmp.lt.s32.totalorder %s75_s15, %s75_s15 }
   0x5   :  { %p82_p3 = por %p81_p2, %p80_p1 }
   0x7   :  { %p83_p4 = pnand %p82_p3, %p76_p0 }
   0x9   :  { %86 = shalt.err (!%p83_p4)
}
   0xa   :  { %s89_s16 = smov [#allocation2]  }
   0xb   :  { %18 = dma.vmem_to_smem %s16_s14, 16, %s89_s16, [#allocation3]  }
   0xc   :  { %87 = dma.done.wait [#allocation3], 16  }
   0xd   :  { %88 = vsyncadd [#allocation3], 4294967280 }
   0xe   :  { %26 = sfence }
   0xf   :  { %s31_s17 = sld [smem:[#allocation2]]  ;;  %v27_v0 = vld [vmem:[%s130_s1] sm:$0xff]  ;;  %v28_v1 = vld [vmem:[%s130_s1 + $0x8] sm:$0xff]  ;;  %vm90_vm2 = vmmov 1  }
  0x10   :  { %s70_s18 = sld [smem:[#allocation2 + $0x1]]  ;;  %v29_v2 = vld [vmem:[%s131_s2] sm:$0xff]  ;;  %v30_v3 = vld [vmem:[%s131_s2 + $0x8] sm:$0xff] }
  0x11   :  { %s71_s19 = sld [smem:[#allocation2 + $0x2]] }
  0x12   :  { %s72_s20 = sld [smem:[#allocation2 + $0x3]] }
  0x15   :  { %v35_v4 = vstv %s31_s17 }
  0x16   :  { %v36_v5 = vsub.f32 %v27_v0, %v35_v4  ;;  %v37_v6 = vsub.f32 %v28_v1, %v35_v4  ;;  %v41_v7 = vstv %s70_s18 }
  0x17   :  { %v38_v8 = vstv %s71_s19  ;;  %v42_v9 = vsub.f32 %v29_v2, %v41_v7  ;;  %v43_v10 = vsub.f32 %v30_v3, %v41_v7 }
  0x18   :  { %v39_v11 = vmul.f32 %v38_v8, %v36_v5  ;;  %v40_v12 = vmul.f32 %v38_v8, %v37_v6  ;;  %v44_v13 = vstv %s72_s20 }
  0x19   :  { %v45_v14 = vmul.f32 %v44_v13, %v42_v9  ;;  %v46_v15 = vmul.f32 %v44_v13, %v43_v10 }
  0x1a   :  { %vm47_vm0 = vweird.f32 %v39_v11  ;;  %vm48_vm1 = vweird.f32 %v40_v12 }
  0x1b   :  { %vm49_vm3 = vmxor %vm47_vm0, %vm90_vm2  ;;  %v51_v16 = vsub.f32 %v45_v14, %v39_v11  ;;  %v52_v17 = vsub.f32 %v46_v15, %v40_v12 }
  0x1c   :  { %vm50_vm4 = vmxor %vm48_vm1, %vm90_vm2 }
  0x1d   :  { %v53_v18 = vand.u32 2147483647, %v51_v16  ;;  %v54_v19 = vand.u32 2147483647, %v52_v17 }
  0x1f   :  { %v55_v20 = vsel %vm49_vm3, %v53_v18, 0.0  ;;  %v56_v21 = vsel %vm50_vm4, %v54_v19, 0.0 }
  0x20   :  { %v57_v22 = vadd.f32 %v56_v21, %v55_v20 }
  0x22   :  { %v58_v23 = vrot.slane %v57_v22, 4 }
  0x24   :  { %v59_v24 = vadd.f32 %v58_v23, %v57_v22 }
  0x26   :  { %v60_v25 = vrot.slane %v59_v24, 2 }
  0x28   :  { %v61_v26 = vadd.f32 %v60_v25, %v59_v24 }
  0x2a   :  { %v62_v27 = vrot.slane %v61_v26, 1 }
  0x2c   :  { %v63_v28 = vadd.f32 %v62_v27, %v61_v26 }
  0x2e   :  { %64 = vst [vmem:[%s132_s3] sm:$0x1] %v63_v28 }
  0x2f   :  { %69 = vsyncpa [#allocation3], 1 }

</bundles_post_ra>
